<compile_context>
chip_gen: v7x
topology: tpu7x:2x2x1
jax: 0.10.0
libtpu: 0.0.40
codegen_flags: <defaults>
</compile_context>

<pallas_src>
import functools

import jax
import jax.numpy as jnp
from jax.experimental import pallas as pl
from jax.experimental.pallas import tpu as pltpu

HIDDEN = 30          # fixed hidden width per the reference module
LANE = 128           # TPU lane width
SUBLANE = 8          # f32 sublane granularity
MAX_TILE_B = 2048    # batch tile cap (amortizes per-step overhead; fits scoped VMEM everywhere)


def _round_up(n, m):
    return ((n + m - 1) // m) * m


def _cdiv(a, b):
    return -(-a // b)


def _mlp_kernel(num_mid, *refs):
    """refs = (x, w1, b1, [wmid, bmid,] wlast, blast, out).

    w1: (input_dim, 30); wmid: (num_mid, 30, 30); wlast: (30, out_pad).
    biases: (1, 30) / (num_mid, 1, 30) / (1, out_pad).
    """
    x_ref, w1_ref, b1_ref = refs[0], refs[1], refs[2]
    if num_mid > 0:
        wmid_ref, bmid_ref, wlast_ref, blast_ref, out_ref = refs[3:]
    else:
        wlast_ref, blast_ref, out_ref = refs[3:]

    h = x_ref[...].astype(jnp.float32)
    h = jnp.tanh(jnp.dot(h, w1_ref[...], preferred_element_type=jnp.float32)
                 + b1_ref[...])
    for i in range(num_mid):                     # static, unrolled layer loop
        h = jnp.tanh(jnp.dot(h, wmid_ref[i], preferred_element_type=jnp.float32)
                     + bmid_ref[i])
    # TODO(synk): lane-pack the 30-wide hidden state (block-diagonal 128x128 weights, 4 batch
    # rows per vreg row) if profiling ever shows this kernel compute-bound at very large batch.
    out_ref[...] = (jnp.dot(h, wlast_ref[...], preferred_element_type=jnp.float32)
                    + blast_ref[...]).astype(out_ref.dtype)


def _vmem_block_bytes(shape):
    """Bytes one f32 VMEM buffer of this block occupies (last dim -> 128 lanes, 2nd-last -> 8)."""
    s = list(shape)
    s[-1] = _round_up(s[-1], LANE)
    if len(s) >= 2:
        s[-2] = _round_up(s[-2], SUBLANE)
    sz = 4
    for d in s:
        sz *= int(d)
    return sz


def net_tanh_forward(x, params):
    """x: (batch, input_dim) f32.  params: list of (W, b) with W shaped (out, in) like PyTorch."""
    num_layers = len(params)
    num_hidden = num_layers - 1
    assert num_hidden >= 1, "Net_tanh requires num_hidden >= 1"
    num_mid = num_hidden - 1
    batch, input_dim = x.shape
    output_dim = params[-1][0].shape[0]

    # Adaptive output padding: never inflate small outputs; lane-align only large ones.
    out_pad = output_dim if output_dim <= LANE else _round_up(output_dim, LANE)

    x = jnp.asarray(x, jnp.float32)

    # --- parameter prep: (in, out) weights, (1, out) biases; stack identical middle layers ---
    w1 = jnp.asarray(params[0][0], jnp.float32).T                    # (input_dim, 30)
    b1 = jnp.asarray(params[0][1], jnp.float32).reshape(1, -1)       # (1, 30)
    wlast = jnp.asarray(params[-1][0], jnp.float32).T                # (30, output_dim)
    blast = jnp.asarray(params[-1][1], jnp.float32).reshape(1, -1)   # (1, output_dim)
    if out_pad != output_dim:
        wlast = jnp.pad(wlast, ((0, 0), (0, out_pad - output_dim)))
        blast = jnp.pad(blast, ((0, 0), (0, out_pad - output_dim)))
    if num_mid > 0:
        wmid = jnp.stack([jnp.asarray(w, jnp.float32).T for w, _ in params[1:-1]])            # (num_mid,30,30)
        bmid = jnp.stack([jnp.asarray(b, jnp.float32).reshape(1, -1) for _, b in params[1:-1]])  # (num_mid,1,30)

    # --- batch tiling: big tiles, minimal ragged padding, >= 2 steps when batch allows (v7x) ---
    n_steps = max(1, _cdiv(batch, MAX_TILE_B))
    if batch > SUBLANE and n_steps < 2:
        n_steps = 2                               # keep both v7x TensorCores busy
    tile_b = _round_up(_cdiv(batch, n_steps), SUBLANE)
    padded_batch = _round_up(batch, tile_b)
    if padded_batch != batch:
        x = jnp.pad(x, ((0, padded_batch - batch), (0, 0)))
    grid = (padded_batch // tile_b,)

    # --- BlockSpecs: x/out streamed over batch; params resident (constant index_map) ---
    const2 = lambda i: (0, 0)
    const3 = lambda i: (0, 0, 0)
    in_specs = [pl.BlockSpec((tile_b, input_dim), lambda i: (i, 0)),
                pl.BlockSpec(w1.shape, const2),
                pl.BlockSpec(b1.shape, const2)]
    args = [x, w1, b1]
    if num_mid > 0:
        in_specs += [pl.BlockSpec(wmid.shape, const3),
                     pl.BlockSpec(bmid.shape, const3)]
        args += [wmid, bmid]
    in_specs += [pl.BlockSpec(wlast.shape, const2),
                 pl.BlockSpec(blast.shape, const2)]
    args += [wlast, blast]
    out_spec = pl.BlockSpec((tile_b, out_pad), lambda i: (i, 0))

    # --- VMEM budget (double-buffered lane/sublane-padded blocks) and advisory cost ---
    vmem_est = 2 * (_vmem_block_bytes((tile_b, input_dim)) + _vmem_block_bytes((tile_b, out_pad)))
    vmem_est += 2 * sum(_vmem_block_bytes(a.shape) for a in args[1:])
    vmem_limit = int(min(max(2 * vmem_est, 32 << 20), 64 << 20))

    dims = [input_dim] + [HIDDEN] * num_hidden + [out_pad]
    flops = sum(2 * padded_batch * dims[i] * dims[i + 1] for i in range(num_layers))
    transcendentals = padded_batch * HIDDEN * num_hidden
    param_bytes = sum(int(a.size) * 4 for a in args[1:])
    bytes_accessed = padded_batch * (input_dim + out_pad) * 4 + param_bytes
    cost = pl.CostEstimate(flops=flops, transcendentals=transcendentals,
                           bytes_accessed=bytes_accessed)

    out_padded = pl.pallas_call(
        functools.partial(_mlp_kernel, num_mid),
        out_shape=jax.ShapeDtypeStruct((padded_batch, out_pad), jnp.float32),
        grid=grid,
        in_specs=in_specs,
        out_specs=out_spec,
        compiler_params=pltpu.CompilerParams(
            dimension_semantics=("parallel",),
            vmem_limit_bytes=vmem_limit),
        cost_estimate=cost,
    )(*args)

    out = out_padded
    if padded_batch != batch:
        out = out[:batch]
    if out_pad != output_dim:
        out = out[:, :output_dim]
    return out


def init_params(key, input_dim, num_hidden, output_dim):
    """Deterministic PyTorch-Linear-style init: U(-1/sqrt(fan_in), 1/sqrt(fan_in))."""
    dims = [input_dim] + [HIDDEN] * num_hidden + [output_dim]
    params = []
    for i in range(len(dims) - 1):
        fan_in, fan_out = dims[i], dims[i + 1]
        key, kw, kb = jax.random.split(key, 3)
        bound = 1.0 / jnp.sqrt(jnp.float32(fan_in))
        w = jax.random.uniform(kw, (fan_out, fan_in), jnp.float32, -bound, bound)
        b = jax.random.uniform(kb, (fan_out,), jnp.float32, -bound, bound)
        params.append((w, b))
    return params


def reference_forward(x, params):
    """Pure-JAX reference matching the PyTorch forward."""
    num_hidden = len(params) - 1
    h = x
    for i, (w, b) in enumerate(params):
        h = h @ w.T + b
        if i < num_hidden:
            h = jnp.tanh(h)
    return h


if __name__ == "__main__":
    input_dim, num_hidden, output_dim = 16, 3, 4
    batch = 8

    key = jax.random.PRNGKey(0)
    key, kx = jax.random.split(key)
    x = jax.random.normal(kx, (batch, input_dim), jnp.float32)
    params = init_params(key, input_dim, num_hidden, output_dim)

    out = jax.block_until_ready(net_tanh_forward(x, params))
    ref = reference_forward(x, params)
    assert out.shape == (batch, output_dim), out.shape
    assert jnp.allclose(out, ref, atol=1e-5, rtol=1e-5), "mismatch vs reference"

    # Ragged larger batch: exercises the multi-step (>=2) grid path used for v7x megacore.
    key, kx2 = jax.random.split(key)
    x2 = jax.random.normal(kx2, (1000, input_dim), jnp.float32)
    out2 = jax.block_until_ready(net_tanh_forward(x2, params))
    ref2 = reference_forward(x2, params)
    assert out2.shape == (1000, output_dim), out2.shape
    assert jnp.allclose(out2, ref2, atol=1e-5, rtol=1e-5), "mismatch vs reference (tiled path)"

    print("KERNEL_OK")
</pallas_src>

<mosaic_0001>
module attributes {stable_mosaic.version = 11 : i64} {
  func.func @_mlp_kernel(%arg0: i32, %arg1: memref<8x16xf32, #tpu.memory_space<vmem>>, %arg2: memref<16x30xf32, #tpu.memory_space<vmem>>, %arg3: memref<1x30xf32, #tpu.memory_space<vmem>>, %arg4: memref<2x30x30xf32, #tpu.memory_space<vmem>>, %arg5: memref<2x1x30xf32, #tpu.memory_space<vmem>>, %arg6: memref<30x4xf32, #tpu.memory_space<vmem>>, %arg7: memref<1x4xf32, #tpu.memory_space<vmem>>, %arg8: memref<8x4xf32, #tpu.memory_space<vmem>>) attributes {dimension_semantics = [#tpu.dimension_semantics<parallel>], iteration_bounds = array<i64: 1>, scalar_prefetch = 0 : i64, scratch_operands = 0 : i64, tpu.core_type = #tpu.core_type<tc>, window_params = [{transform_indices = @transform_0, window_bounds = array<i64: 8, 16>}, {pipeline_mode = #tpu.pipeline_mode<synchronous>, transform_indices = @transform_1, window_bounds = array<i64: 16, 30>}, {pipeline_mode = #tpu.pipeline_mode<synchronous>, transform_indices = @transform_2, window_bounds = array<i64: 1, 30>}, {pipeline_mode = #tpu.pipeline_mode<synchronous>, transform_indices = @transform_3, window_bounds = array<i64: 2, 30, 30>}, {pipeline_mode = #tpu.pipeline_mode<synchronous>, transform_indices = @transform_4, window_bounds = array<i64: 2, 1, 30>}, {pipeline_mode = #tpu.pipeline_mode<synchronous>, transform_indices = @transform_5, window_bounds = array<i64: 30, 4>}, {pipeline_mode = #tpu.pipeline_mode<synchronous>, transform_indices = @transform_6, window_bounds = array<i64: 1, 4>}, {transform_indices = @transform_7, window_bounds = array<i64: 8, 4>}]} {
    %c0 = arith.constant 0 : index
    %c0_0 = arith.constant 0 : index
    %0 = vector.load %arg1[%c0, %c0_0] : memref<8x16xf32, #tpu.memory_space<vmem>>, vector<8x16xf32>
    %c0_1 = arith.constant 0 : index
    %c0_2 = arith.constant 0 : index
    %1 = vector.load %arg2[%c0_1, %c0_2] : memref<16x30xf32, #tpu.memory_space<vmem>>, vector<16x30xf32>
    %cst = arith.constant dense<0.000000e+00> : vector<8x30xf32>
    %2 = tpu.matmul %0, %1, %cst {dimension_numbers = #tpu.dot_dimension_numbers<[1], [0], [0], [1], [0, 0, 1, 1], [], []>} : vector<8x16xf32>, vector<16x30xf32>, vector<8x30xf32> -> vector<8x30xf32>
    %c0_3 = arith.constant 0 : index
    %c0_4 = arith.constant 0 : index
    %3 = vector.load %arg3[%c0_3, %c0_4] : memref<1x30xf32, #tpu.memory_space<vmem>>, vector<1x30xf32>
    %4 = vector.broadcast %3 : vector<1x30xf32> to vector<8x30xf32>
    %5 = arith.addf %2, %4 : vector<8x30xf32>
    %6 = math.tanh %5 : vector<8x30xf32>
    %c0_5 = arith.constant 0 : index
    %c0_6 = arith.constant 0 : index
    %c0_7 = arith.constant 0 : index
    %7 = vector.load %arg4[%c0_5, %c0_6, %c0_7] : memref<2x30x30xf32, #tpu.memory_space<vmem>>, vector<1x30x30xf32>
    %8 = vector.shape_cast %7 : vector<1x30x30xf32> to vector<30x30xf32>
    %cst_8 = arith.constant dense<0.000000e+00> : vector<8x30xf32>
    %9 = tpu.matmul %6, %8, %cst_8 {dimension_numbers = #tpu.dot_dimension_numbers<[1], [0], [0], [1], [0, 0, 1, 1], [], []>} : vector<8x30xf32>, vector<30x30xf32>, vector<8x30xf32> -> vector<8x30xf32>
    %c0_9 = arith.constant 0 : index
    %c0_10 = arith.constant 0 : index
    %c0_11 = arith.constant 0 : index
    %10 = vector.load %arg5[%c0_9, %c0_10, %c0_11] : memref<2x1x30xf32, #tpu.memory_space<vmem>>, vector<1x1x30xf32>
    %11 = vector.shape_cast %10 : vector<1x1x30xf32> to vector<1x30xf32>
    %12 = vector.broadcast %11 : vector<1x30xf32> to vector<8x30xf32>
    %13 = arith.addf %9, %12 : vector<8x30xf32>
    %14 = math.tanh %13 : vector<8x30xf32>
    %c1 = arith.constant 1 : index
    %c0_12 = arith.constant 0 : index
    %c0_13 = arith.constant 0 : index
    %15 = vector.load %arg4[%c1, %c0_12, %c0_13] : memref<2x30x30xf32, #tpu.memory_space<vmem>>, vector<1x30x30xf32>
    %16 = vector.shape_cast %15 : vector<1x30x30xf32> to vector<30x30xf32>
    %cst_14 = arith.constant dense<0.000000e+00> : vector<8x30xf32>
    %17 = tpu.matmul %14, %16, %cst_14 {dimension_numbers = #tpu.dot_dimension_numbers<[1], [0], [0], [1], [0, 0, 1, 1], [], []>} : vector<8x30xf32>, vector<30x30xf32>, vector<8x30xf32> -> vector<8x30xf32>
    %c1_15 = arith.constant 1 : index
    %c0_16 = arith.constant 0 : index
    %c0_17 = arith.constant 0 : index
    %18 = vector.load %arg5[%c1_15, %c0_16, %c0_17] : memref<2x1x30xf32, #tpu.memory_space<vmem>>, vector<1x1x30xf32>
    %19 = vector.shape_cast %18 : vector<1x1x30xf32> to vector<1x30xf32>
    %20 = vector.broadcast %19 : vector<1x30xf32> to vector<8x30xf32>
    %21 = arith.addf %17, %20 : vector<8x30xf32>
    %22 = math.tanh %21 : vector<8x30xf32>
    %c0_18 = arith.constant 0 : index
    %c0_19 = arith.constant 0 : index
    %23 = vector.load %arg6[%c0_18, %c0_19] : memref<30x4xf32, #tpu.memory_space<vmem>>, vector<30x4xf32>
    %cst_20 = arith.constant dense<0.000000e+00> : vector<8x4xf32>
    %24 = tpu.matmul %22, %23, %cst_20 {dimension_numbers = #tpu.dot_dimension_numbers<[1], [0], [0], [1], [0, 0, 1, 1], [], []>} : vector<8x30xf32>, vector<30x4xf32>, vector<8x4xf32> -> vector<8x4xf32>
    %c0_21 = arith.constant 0 : index
    %c0_22 = arith.constant 0 : index
    %25 = vector.load %arg7[%c0_21, %c0_22] : memref<1x4xf32, #tpu.memory_space<vmem>>, vector<1x4xf32>
    %26 = vector.broadcast %25 : vector<1x4xf32> to vector<8x4xf32>
    %27 = arith.addf %24, %26 : vector<8x4xf32>
    %c0_23 = arith.constant 0 : index
    %c0_24 = arith.constant 0 : index
    %28 = vector.load %arg8[%c0_23, %c0_24] : memref<8x4xf32, #tpu.memory_space<vmem>>, vector<8x4xf32>
    tpu.vector_store %arg8[%c0_23, %c0_24], %27 {strides = array<i32>} : memref<8x4xf32, #tpu.memory_space<vmem>>, vector<8x4xf32>,
    return
  }
  func.func @transform_0(%arg0: i32) -> (i32, i32) {
    %c0_i32 = arith.constant 0 : i32
    %c0_i32_0 = arith.constant 0 : i32
    return %arg0, %c0_i32 : i32, i32
  }
  func.func @transform_1(%arg0: i32) -> (i32, i32) {
    %c0_i32 = arith.constant 0 : i32
    %c0_i32_0 = arith.constant 0 : i32
    %c0_i32_1 = arith.constant 0 : i32
    return %c0_i32, %c0_i32_0 : i32, i32
  }
  func.func @transform_2(%arg0: i32) -> (i32, i32) {
    %c0_i32 = arith.constant 0 : i32
    %c0_i32_0 = arith.constant 0 : i32
    %c0_i32_1 = arith.constant 0 : i32
    return %c0_i32, %c0_i32_0 : i32, i32
  }
  func.func @transform_3(%arg0: i32) -> (i32, i32, i32) {
    %c0_i32 = arith.constant 0 : i32
    %c0_i32_0 = arith.constant 0 : i32
    %c0_i32_1 = arith.constant 0 : i32
    %c0_i32_2 = arith.constant 0 : i32
    return %c0_i32, %c0_i32_0, %c0_i32_1 : i32, i32, i32
  }
  func.func @transform_4(%arg0: i32) -> (i32, i32, i32) {
    %c0_i32 = arith.constant 0 : i32
    %c0_i32_0 = arith.constant 0 : i32
    %c0_i32_1 = arith.constant 0 : i32
    %c0_i32_2 = arith.constant 0 : i32
    return %c0_i32, %c0_i32_0, %c0_i32_1 : i32, i32, i32
  }
  func.func @transform_5(%arg0: i32) -> (i32, i32) {
    %c0_i32 = arith.constant 0 : i32
    %c0_i32_0 = arith.constant 0 : i32
    %c0_i32_1 = arith.constant 0 : i32
    return %c0_i32, %c0_i32_0 : i32, i32
  }
  func.func @transform_6(%arg0: i32) -> (i32, i32) {
    %c0_i32 = arith.constant 0 : i32
    %c0_i32_0 = arith.constant 0 : i32
    %c0_i32_1 = arith.constant 0 : i32
    return %c0_i32, %c0_i32_0 : i32, i32
  }
  func.func @transform_7(%arg0: i32) -> (i32, i32) {
    %c0_i32 = arith.constant 0 : i32
    %c0_i32_0 = arith.constant 0 : i32
    return %arg0, %c0_i32 : i32, i32
  }
}

</mosaic_0001>

<bundles_post_ra>
// kernel: tpu_custom_call.1
= control target key start
LH: loop header
LB: loop body
LE: loop exit
PB: predicated region body
PF: predicated region fallthrough
CT: control target
= control target key end

     0   :  { %v492_v0 = vmov 0.0|0.0   ;;  %vm493_vm0 = vmmov 0   ;;  %v494_v3 = vmov 0.0   ;;  %vm36_vm1 = vcmask 130048   ;;  %s620_s1 = inlined_call_operand.vmem [shape: f32[16,30], index: 1, kind: input, shape index: {}]   ;;  %s621_s0 = inlined_call_operand.vmem [shape: f32[8,16], index: 0, kind: input, shape index: {}]   ;;  %s622_s3 = inlined_call_operand.vmem [shape: f32[2,30,30], index: 3, kind: input, shape index: {}]   ;;  %s623_s2 = inlined_call_operand.vmem [shape: f32[1,30], index: 2, kind: input, shape index: {}]   ;;  %s624_s4 = inlined_call_operand.vmem [shape: f32[2,1,30], index: 4, kind: input, shape index: {}]   ;;  %s625_s5 = inlined_call_operand.vmem [shape: f32[30,4], index: 5, kind: input, shape index: {}]   ;;  %s626_s6 = inlined_call_operand.vmem [shape: f32[1,4], index: 6, kind: input, shape index: {}]   ;;  %s627_s7 = inlined_call_operand.vmem [shape: f32[8,4], index: 7, kind: output, shape index: {}]  }
   0x1   :  { %458 = vmatprep.subr.bf16.mxu0 %v492_v0  ;;  %v27_v1 = vld [vmem:[%s620_s1] sm:$0xff]  ;;  %v28_v2 = vld [vmem:[%s620_s1 + $0x8] sm:$0xff]  ;;  %422 = vmatprep.mubr.msk.f32.mxu0 %vm493_vm0, %v494_v3  ;;  %v113_v8 = vld [vmem:[%s622_s3 + $0x10] sm:$0xff]  ;;  %vm126_vm2 = vcmask 1045504   ;;  %vm495_vm3 = vmmov 1   ;;  %vm122_vm5 = vcmask 244736  }
   0x2   :  { %v459_v4 = vpack.c.bf16 %v28_v2, %v27_v1  ;;  %461 = vmatprep.subr.bf16.mxu1 %v492_v0  ;;  %433 = vmatprep.mubr.msk.f32.mxu1 %vm493_vm0, %v494_v3  ;;  %v26_v5 = vld [vmem:[%s621_s0] sm:$0xff]  ;;  %v112_v7 = vld [vmem:[%s622_s3 + $0x8] sm:$0xff]  ;;  %v114_v10 = vld [vmem:[%s622_s3 + $0x18] sm:$0x3f]  ;;  %vm378_vm6 = vcmask 31744  }
   0x3   :  { %v111_v6 = vld [vmem:[%s622_s3] sm:$0xff]  ;;  %v465_v11 = vpack.c.bf16 %v114_v10, %v113_v8  ;;  %vm564_vm4 = vmpackc.low %vm126_vm2, %vm495_vm3  ;;  %v390_v19 = vld [vmem:[%s622_s3 + $0x28] sm:$0xff] }
   0x4   :  { %460 = vmatpush3.bf16.msra.mxu0 %v459_v4  ;;  %v462_v9 = vpack.c.bf16 %v112_v7, %v111_v6  ;;  %v384_v13 = vld [vmem:[%s623_s2] ss:$0 sm:$0xff]  ;;  %v391_v20 = vld [vmem:[%s622_s3 + $0x30] sm:$0xff]  ;;  %v392_v22 = vld [vmem:[%s622_s3 + $0x38] sm:$0x3f] }
   0x5   :  { %468 = vmatprep.subr.bf16.mxu0 %v492_v0  ;;  %v389_v18 = vld [vmem:[%s622_s3 + $0x20] sm:$0xff]  ;;  %v472_v23 = vpack.c.bf16 %v392_v22, %v391_v20  ;;  %v292_v30 = vld [vmem:[%s625_s5 + $0x8] sm:$0xff]  ;;  %v293_v31 = vld [vmem:[%s625_s5 + $0x10] sm:$0xff] }
   0x6   :  { %463 = vmatpush3.bf16.msra.mxu1 %v462_v9  ;;  %v469_v21 = vpack.c.bf16 %v390_v19, %v389_v18  ;;  %v386_v24 = vld [vmem:[%s624_s4] ss:$0 sm:$0xff]  ;;  %v294_v33 = vld [vmem:[%s625_s5 + $0x18] sm:$0x3f]  ;;  %v394_v35 = vld [vmem:[%s624_s4 + $0x1] ss:$0 sm:$0xff] }
   0x7   :  { %423 = vmatmul.mubr.msk.f32.vlgmr.msra.gmra.mrb[0].mxu0 %vm36_vm1, %v26_v5  ;;  %464 = vmatprep.subr.bf16.mxu1 %v492_v0  ;;  %v291_v29 = vld [vmem:[%s625_s5] sm:$0xff]  ;;  %v479_v34 = vpack.c.bf16 %v294_v33, %v293_v31 }
   0x8   :  { %444 = vmatprep.mubr.msk.f32.mxu0 %vm493_vm0, %v494_v3  ;;  %470 = vmatpush3.bf16.msra.mxu0 %v469_v21  ;;  %v476_v32 = vpack.c.bf16 %v292_v30, %v291_v29  ;;  %v397_v40 = vld [vmem:[%s626_s6] ss:$0 sm:$0xff] }
   0x9   :  { %471 = vmatprep.subr.bf16.mxu0 %v492_v0 }
   0xa   :  { %467 = vmatpush3.bf16.msk.msra.mxu1 %vm564_vm4, %v465_v11 }
   0xb   :  { %475 = vmatprep.subr.bf16.mxu1 %v492_v0 }
   0xc   :  { %474 = vmatpush3.bf16.msk.msra.mxu0 %vm564_vm4, %v472_v23 }
  0xda   :  { %v106_v14 = vpop.f32.mrb[0].mxu0 }
  0xdb   :  { %v107_v15 = vadd.f32 %v384_v13, %v106_v14  ;;  %v424_v16 = vpop.f32.mrb[1].mxu0 }
  0xdd   :  { %486 = vtanh.f32 %v107_v15 }
  0xe7   :  { %v487_v17 = vpop.eup %486 }
  0xe8   :  { %434 = vmatmul.mubr.msk.f32.vlgmr.msra.gmra.mrb[0].mxu1 %vm122_vm5, %v487_v17 }
  0xe9   :  { %455 = vmatprep.mubr.msk.f32.mxu1 %vm493_vm0, %v494_v3  ;;  %477 = vmatpush3.bf16.msra.mxu1 %v476_v32 }
  0xea   :  { %478 = vmatprep.subr.bf16.mxu1 %v492_v0 }
  0xed   :  { %481 = vmatpush3.bf16.msk.msra.mxu1 %vm564_vm4, %v479_v34 }
 0x1bb   :  { %v196_v25 = vpop.f32.mrb[0].mxu1 }
 0x1bc   :  { %v197_v26 = vadd.f32 %v386_v24, %v196_v25  ;;  %v435_v27 = vpop.f32.mrb[1].mxu1 }
 0x1be   :  { %488 = vtanh.f32 %v197_v26 }
 0x1c8   :  { %v489_v28 = vpop.eup %488 }
 0x1c9   :  { %445 = vmatmul.mubr.msk.f32.vlgmr.msra.gmra.mrb[2].mxu0 %vm122_vm5, %v489_v28 }
 0x29c   :  { %v286_v36 = vpop.f32.mrb[2].mxu0 }
 0x29d   :  { %v287_v37 = vadd.f32 %v394_v35, %v286_v36  ;;  %v446_v38 = vpop.f32.mrb[3].mxu0 }
 0x29f   :  { %490 = vtanh.f32 %v287_v37 }
 0x2a9   :  { %v491_v39 = vpop.eup %490 }
 0x2aa   :  { %456 = vmatmul.mubr.msk.f32.vlgmr.msra.gmra.mrb[2].mxu1 %vm122_vm5, %v491_v39 }
 0x37d   :  { %v374_v41 = vpop.f32.mrb[2].mxu1 }
 0x37e   :  { %v375_v42 = vadd.f32 %v397_v40, %v374_v41  ;;  %v457_v43 = vpop.f32.mrb[3].mxu1 }
 0x380   :  { %379 = vst.msk [vmem:[%s627_s7] sm:$0xff] %vm378_vm6, %v375_v42 }

</bundles_post_ra>
